<compile_context>
chip_gen: v5e
topology: v5e:2x2
jax: 0.10.0
libtpu: 0.0.40
codegen_flags: <defaults>
</compile_context>

<pallas_src>
import functools
import math

import jax
import jax.numpy as jnp
import numpy as np
from jax.experimental import pallas as pl
from jax.experimental.pallas import tpu as pltpu


def conv1d_block_kernel(x_ref, w_ref, g_ref, beta_ref, sseg_ref, ssegt_ref,
                        dcol_ref, drow_ref, o_ref, *, pf, ps, c_out, inv_len, eps):
    """Processes one batch block.

    x_ref    : (C_in*K, Nb)    bf16  im2col'd input (lanes = batch-in-block * conv length)
    w_ref    : (C_out, C_in*K) bf16  conv weight in im2col layout
    g_ref    : (1, Nb)         f32   LayerNorm gamma, tiled per length segment
    beta_ref : (1, Nb)         f32   LayerNorm beta,  tiled per length segment
    sseg_ref : (Nb, B_blk)     bf16  0/1 segment-sum matrix (length-Lc lane segments)
    ssegt_ref: (B_blk, Nb)     bf16  its transpose (broadcast stats back)
    dcol_ref : (Nb, Np)        bf16  0/1 lane compaction (window-start lane -> pooled lane)
    drow_ref : (op, C_out)     bf16  0/1 row  compaction (window-start row  -> pooled row)
    o_ref    : (op, Np)        f32   pooled output (batch packed into lanes)
    """
    # --- Conv1d: ONE im2col matmul on the MXU (bf16 in, f32 accumulate).  The conv bias
    # is intentionally omitted: LayerNorm over the length axis cancels a per-channel
    # constant exactly, so adding it would be wasted VPU work and an extra DMA.
    acc = jnp.dot(w_ref[...], x_ref[...], preferred_element_type=jnp.float32)  # (C_out, Nb)

    # --- LayerNorm over each length-Lc lane segment: one-pass stats via a single fused
    # exact 0/1 matmul  [acc ; acc*acc] @ sseg -> [segment sum ; segment sum of squares].
    stacked = jnp.concatenate(
        [acc.astype(jnp.bfloat16), (acc * acc).astype(jnp.bfloat16)], axis=0)
    stats = jnp.dot(stacked, sseg_ref[...],
                    preferred_element_type=jnp.float32)            # (2*C_out, B_blk)
    mean = stats[:c_out] * inv_len
    var = jnp.maximum(stats[c_out:] * inv_len - mean * mean, 0.0)  # cancellation guard
    rstd = jax.lax.rsqrt(var + eps)
    # Broadcast both stats back across their length segments with one fused matmul.
    stats_b = jnp.concatenate([mean, rstd], axis=0).astype(jnp.bfloat16)
    stats_f = jnp.dot(stats_b, ssegt_ref[...],
                      preferred_element_type=jnp.float32)          # (2*C_out, Nb)
    y = (acc - stats_f[:c_out]) * stats_f[c_out:] * g_ref[...] + beta_ref[...]

    # --- ReLU ---
    y = jnp.maximum(y, 0.0)

    # --- MaxPool2d, kernel (ps, pf), stride == kernel, floor mode.
    # Window maxima via cheap rotations + elementwise maxima (no O(Nb^2) selector work):
    wmax = y
    for j in range(1, pf):                       # pool along the conv-length (lane) axis
        wmax = jnp.maximum(wmax, jnp.roll(y, -j, axis=-1))
    cmax = wmax
    for p in range(1, ps):                       # pool along the channel (sublane) axis
        cmax = jnp.maximum(cmax, jnp.roll(wmax, -p, axis=0))
    # ...then compact the window-start rows/lanes into the dense pooled layout with two
    # tiny exact 0/1 bf16 selector matmuls (row compaction first: op < C_out).
    zrow = jnp.dot(drow_ref[...], cmax.astype(jnp.bfloat16),
                   preferred_element_type=jnp.float32)             # (op, Nb)
    pooled = jnp.dot(zrow.astype(jnp.bfloat16), dcol_ref[...],
                     preferred_element_type=jnp.float32)           # (op, Np)
    o_ref[...] = pooled.astype(o_ref.dtype)


@functools.lru_cache(maxsize=None)
def _block_constants(B_blk, Lc, lp, pf, ps, op, C_out):
    """Shape-only 0/1 selectors: built once per shape (numpy), cached as bf16 device arrays."""
    Nb, Np = B_blk * Lc, B_blk * lp
    seg = np.arange(Nb) // Lc                     # which batch segment a lane belongs to
    pos = np.arange(Nb) % Lc                      # position within its segment
    sseg = (seg[:, None] == np.arange(B_blk)[None, :])                            # (Nb, B_blk)
    pb, pi = np.arange(Np) // lp, np.arange(Np) % lp
    dcol = (seg[:, None] == pb[None, :]) & (pos[:, None] == (pi * pf)[None, :])   # (Nb, Np)
    drow = (np.arange(C_out)[None, :] == (np.arange(op) * ps)[:, None])           # (op, C_out)
    to_dev = lambda a: jnp.asarray(a.astype(np.float32), dtype=jnp.bfloat16)
    return to_dev(sseg), to_dev(sseg.T), to_dev(dcol), to_dev(drow)


def _choose_batch_block(B, Lc, lp, target_lanes=512):
    """Batch elements per grid block.

    Per-block conv lanes (B_blk*Lc) are capped at ~target_lanes so every per-block
    intermediate / selector stays small (fits VMEM comfortably on v5e/v6e/v7x).
    Multi-block runs keep both per-block lane dims (B_blk*Lc and B_blk*lp) multiples of
    128 (unmasked, lane-dense tiles); `unit` is the smallest batch count satisfying that,
    so larger batches always get >= 2 "parallel" grid blocks (v7x dual-TC sharding).
    """
    if B * Lc <= target_lanes:
        return B
    unit = math.lcm(128 // math.gcd(Lc, 128), 128 // math.gcd(lp, 128))
    if unit >= B:
        # TODO(synk): for very large single blocks with alignment-hostile Lc, the lane
        # compaction selector grows; fine for this model's shapes, revisit if Lc ~ 1000s.
        return B
    return unit * max(1, target_lanes // (unit * Lc))


def conv1d_block_forward(x, params, *, conv_padding, pool_kernel_size, dim='features'):
    """JAX/Pallas equivalent of Conv1DBlock.forward."""
    w, b, gamma, beta = params            # w: (C_out, C_in, K) -- PyTorch Conv1d layout
    del b                                 # cancelled exactly by the length-axis LayerNorm
    orig_dtype = x.dtype

    if dim == 'sequence':
        x = jnp.transpose(x, (0, 2, 1))

    B, C_in, L = x.shape
    C_out, _, K = w.shape
    Lc = L + 2 * conv_padding - K + 1     # layernorm1d_input_size

    if dim == 'features':
        ps, pf = pool_kernel_size['sequence'], pool_kernel_size['features']
    else:                                  # 'sequence' -> MaxPool2d([features, sequence])
        ps, pf = pool_kernel_size['features'], pool_kernel_size['sequence']

    op = (C_out - ps) // ps + 1           # pooled channel dim
    lp = (Lc - pf) // pf + 1              # pooled length dim
    if op <= 0 or lp <= 0:
        raise ValueError(f"pool kernel larger than input: op={op}, lp={lp}")

    B_blk = _choose_batch_block(B, Lc, lp)
    num_blocks = -(-B // B_blk)
    B_pad = num_blocks * B_blk
    Nb, Np, CK = B_blk * Lc, B_blk * lp, C_in * K

    # One-time wrapper-side im2col slab (conv zero padding + batch padding folded in).
    xp = jnp.pad(x, ((0, B_pad - B), (0, 0), (conv_padding, conv_padding)))
    taps = jnp.stack([xp[:, :, k:k + Lc] for k in range(K)], axis=2)   # (B_pad, C_in, K, Lc)
    x_unf = jnp.transpose(taps, (1, 2, 0, 3)).reshape(CK, B_pad * Lc).astype(jnp.bfloat16)

    w2 = w.reshape(C_out, CK).astype(jnp.bfloat16)                     # bf16 MXU operand
    gamma_t = jnp.tile(gamma.astype(jnp.float32), B_blk).reshape(1, Nb)
    beta_t = jnp.tile(beta.astype(jnp.float32), B_blk).reshape(1, Nb)
    sseg, ssegt, dcol, drow = _block_constants(B_blk, Lc, lp, pf, ps, op, C_out)

    kernel = functools.partial(conv1d_block_kernel, pf=pf, ps=ps, c_out=C_out,
                               inv_len=1.0 / Lc, eps=1e-5)

    # Rough per-block VMEM footprint (double-buffered blocks + live f32 intermediates),
    # 4x margin, clamped to limits every generation can scope.
    block_bytes = (2 * CK * Nb * 2 + 2 * C_out * CK * 2 + 2 * 2 * Nb * 4
                   + 2 * 2 * Nb * B_blk * 2 + 2 * Nb * Np * 2 + 2 * op * C_out * 2
                   + 2 * op * Np * 4 + 8 * C_out * Nb * 4)
    vmem_limit = int(min(max(4 * block_bytes, 16 << 20), 48 << 20))

    out2d = pl.pallas_call(
        kernel,
        out_shape=jax.ShapeDtypeStruct((op, num_blocks * Np), jnp.float32),
        grid=(num_blocks,),
        in_specs=[
            pl.BlockSpec((CK, Nb), lambda i: (0, i)),          # im2col input block
            pl.BlockSpec((C_out, CK), lambda i: (0, 0)),       # conv weight
            pl.BlockSpec((1, Nb), lambda i: (0, 0)),           # LN gamma (tiled)
            pl.BlockSpec((1, Nb), lambda i: (0, 0)),           # LN beta  (tiled)
            pl.BlockSpec((Nb, B_blk), lambda i: (0, 0)),       # segment-sum selector
            pl.BlockSpec((B_blk, Nb), lambda i: (0, 0)),       # its transpose
            pl.BlockSpec((Nb, Np), lambda i: (0, 0)),          # lane compaction selector
            pl.BlockSpec((op, C_out), lambda i: (0, 0)),       # row  compaction selector
        ],
        out_specs=pl.BlockSpec((op, Np), lambda i: (0, i)),    # lane-dense pooled tile
        compiler_params=pltpu.CompilerParams(
            dimension_semantics=("parallel",), vmem_limit_bytes=vmem_limit),
    )(x_unf, w2, gamma_t, beta_t, sseg, ssegt, dcol, drow)

    # (op, B_pad*lp) -> (B, op, lp)
    out = jnp.transpose(out2d.reshape(op, B_pad, lp), (1, 0, 2))[:B].astype(orig_dtype)
    if dim == 'sequence':
        out = jnp.transpose(out, (0, 2, 1))
    return out


def _reference_forward(x, params, *, conv_padding, pool_kernel_size, dim='features'):
    """Pure-JAX f32 reference for the module's math (includes the bias, like PyTorch)."""
    w, b, gamma, beta = params
    if dim == 'sequence':
        x = jnp.transpose(x, (0, 2, 1))
    B, C_in, L = x.shape
    C_out, _, K = w.shape
    Lc = L + 2 * conv_padding - K + 1
    xp = jnp.pad(x, ((0, 0), (0, 0), (conv_padding, conv_padding))).astype(jnp.float32)
    acc = jnp.zeros((B, C_out, Lc), jnp.float32)
    for dk in range(K):
        acc = acc + jnp.einsum('oc,bcl->bol', w[:, :, dk].astype(jnp.float32),
                               xp[:, :, dk:dk + Lc])
    acc = acc + b[None, :, None].astype(jnp.float32)
    mean = jnp.mean(acc, axis=-1, keepdims=True)
    var = jnp.mean((acc - mean) ** 2, axis=-1, keepdims=True)
    y = (acc - mean) / jnp.sqrt(var + 1e-5) * gamma[None, None, :] + beta[None, None, :]
    y = jnp.maximum(y, 0.0)
    if dim == 'features':
        ps, pf = pool_kernel_size['sequence'], pool_kernel_size['features']
    else:
        ps, pf = pool_kernel_size['features'], pool_kernel_size['sequence']
    op = (C_out - ps) // ps + 1
    lp = (Lc - pf) // pf + 1
    y = y[:, :op * ps, :lp * pf].reshape(B, op, ps, lp, pf)
    out = jnp.max(y, axis=(2, 4))
    if dim == 'sequence':
        out = jnp.transpose(out, (0, 2, 1))
    return out


if __name__ == "__main__":
    keys = jax.random.split(jax.random.PRNGKey(0), 10)

    # ---------------- case 1: dim='features' ----------------
    B, in_channels, out_channels = 8, 4, 8
    conv_kernel_size, conv_padding = 3, 1
    input_size = {'sequence': in_channels, 'features': 16}
    pool_kernel_size = {'sequence': 2, 'features': 2}
    Lc = input_size['features'] + 2 * conv_padding - conv_kernel_size + 1

    x = jax.random.normal(keys[0], (B, in_channels, input_size['features']), jnp.float32)
    w = 0.1 * jax.random.normal(keys[1], (out_channels, in_channels, conv_kernel_size), jnp.float32)
    b = 0.1 * jax.random.normal(keys[2], (out_channels,), jnp.float32)
    gamma = 1.0 + 0.1 * jax.random.normal(keys[3], (Lc,), jnp.float32)
    beta = 0.1 * jax.random.normal(keys[4], (Lc,), jnp.float32)
    params = (w, b, gamma, beta)

    out = jax.block_until_ready(conv1d_block_forward(
        x, params, conv_padding=conv_padding, pool_kernel_size=pool_kernel_size,
        dim='features'))
    ref = _reference_forward(x, params, conv_padding=conv_padding,
                             pool_kernel_size=pool_kernel_size, dim='features')
    assert out.shape == ref.shape, (out.shape, ref.shape)
    assert jnp.allclose(out, ref, rtol=5e-2, atol=5e-2), \
        f"features mismatch, max err {jnp.max(jnp.abs(out - ref))}"

    # ---------------- case 2: dim='sequence' ----------------
    B2, feat2, seq2 = 4, 6, 12
    pool2 = {'sequence': 2, 'features': 2}
    Lc2 = seq2 + 2 * conv_padding - conv_kernel_size + 1
    x2 = jax.random.normal(keys[5], (B2, seq2, feat2), jnp.float32)
    w_2 = 0.1 * jax.random.normal(keys[6], (out_channels, feat2, conv_kernel_size), jnp.float32)
    b_2 = 0.1 * jax.random.normal(keys[7], (out_channels,), jnp.float32)
    gamma2 = 1.0 + 0.1 * jax.random.normal(keys[8], (Lc2,), jnp.float32)
    beta2 = 0.1 * jax.random.normal(keys[9], (Lc2,), jnp.float32)
    params2 = (w_2, b_2, gamma2, beta2)

    out2 = jax.block_until_ready(conv1d_block_forward(
        x2, params2, conv_padding=conv_padding, pool_kernel_size=pool2, dim='sequence'))
    ref2 = _reference_forward(x2, params2, conv_padding=conv_padding,
                              pool_kernel_size=pool2, dim='sequence')
    assert out2.shape == ref2.shape, (out2.shape, ref2.shape)
    assert jnp.allclose(out2, ref2, rtol=5e-2, atol=5e-2), \
        f"sequence mismatch, max err {jnp.max(jnp.abs(out2 - ref2))}"

    print("KERNEL_OK")
</pallas_src>

<mosaic_0001>
module attributes {stable_mosaic.version = 11 : i64} {
  func.func @conv1d_block_kernel(%arg0: i32, %arg1: memref<12x128xbf16, #tpu.memory_space<vmem>>, %arg2: memref<8x12xbf16, #tpu.memory_space<vmem>>, %arg3: memref<1x128xf32, #tpu.memory_space<vmem>>, %arg4: memref<1x128xf32, #tpu.memory_space<vmem>>, %arg5: memref<128x8xbf16, #tpu.memory_space<vmem>>, %arg6: memref<8x128xbf16, #tpu.memory_space<vmem>>, %arg7: memref<128x64xbf16, #tpu.memory_space<vmem>>, %arg8: memref<4x8xbf16, #tpu.memory_space<vmem>>, %arg9: memref<4x64xf32, #tpu.memory_space<vmem>>) attributes {dimension_semantics = [#tpu.dimension_semantics<parallel>], iteration_bounds = array<i64: 1>, scalar_prefetch = 0 : i64, scratch_operands = 0 : i64, tpu.core_type = #tpu.core_type<tc>, window_params = [{transform_indices = @transform_0, window_bounds = array<i64: 12, 128>}, {pipeline_mode = #tpu.pipeline_mode<synchronous>, transform_indices = @transform_1, window_bounds = array<i64: 8, 12>}, {pipeline_mode = #tpu.pipeline_mode<synchronous>, transform_indices = @transform_2, window_bounds = array<i64: 1, 128>}, {pipeline_mode = #tpu.pipeline_mode<synchronous>, transform_indices = @transform_3, window_bounds = array<i64: 1, 128>}, {pipeline_mode = #tpu.pipeline_mode<synchronous>, transform_indices = @transform_4, window_bounds = array<i64: 128, 8>}, {pipeline_mode = #tpu.pipeline_mode<synchronous>, transform_indices = @transform_5, window_bounds = array<i64: 8, 128>}, {pipeline_mode = #tpu.pipeline_mode<synchronous>, transform_indices = @transform_6, window_bounds = array<i64: 128, 64>}, {pipeline_mode = #tpu.pipeline_mode<synchronous>, transform_indices = @transform_7, window_bounds = array<i64: 4, 8>}, {transform_indices = @transform_8, window_bounds = array<i64: 4, 64>}]} {
    %c0 = arith.constant 0 : index
    %c0_0 = arith.constant 0 : index
    %0 = vector.load %arg2[%c0, %c0_0] : memref<8x12xbf16, #tpu.memory_space<vmem>>, vector<8x12xbf16>
    %c0_1 = arith.constant 0 : index
    %c0_2 = arith.constant 0 : index
    %1 = vector.load %arg1[%c0_1, %c0_2] : memref<12x128xbf16, #tpu.memory_space<vmem>>, vector<12x128xbf16>
    %cst = arith.constant dense<0.000000e+00> : vector<8x128xf32>
    %2 = tpu.matmul %0, %1, %cst {dimension_numbers = #tpu.dot_dimension_numbers<[1], [0], [0], [1], [0, 0, 1, 1], [], []>} : vector<8x12xbf16>, vector<12x128xbf16>, vector<8x128xf32> -> vector<8x128xf32>
    %3 = arith.truncf %2 : vector<8x128xf32> to vector<8x128xbf16>
    %4 = arith.mulf %2, %2 : vector<8x128xf32>
    %5 = arith.truncf %4 : vector<8x128xf32> to vector<8x128xbf16>
    %6 = tpu.concatenate %3, %5 in 0 : vector<8x128xbf16>, vector<8x128xbf16> -> vector<16x128xbf16>
    %c0_3 = arith.constant 0 : index
    %c0_4 = arith.constant 0 : index
    %7 = vector.load %arg5[%c0_3, %c0_4] : memref<128x8xbf16, #tpu.memory_space<vmem>>, vector<128x8xbf16>
    %cst_5 = arith.constant dense<0.000000e+00> : vector<16x8xf32>
    %8 = tpu.matmul %6, %7, %cst_5 {dimension_numbers = #tpu.dot_dimension_numbers<[1], [0], [0], [1], [0, 0, 1, 1], [], []>} : vector<16x128xbf16>, vector<128x8xbf16>, vector<16x8xf32> -> vector<16x8xf32>
    %9 = vector.extract_strided_slice %8 {offsets = [0, 0], sizes = [8, 8], strides = [1, 1]} : vector<16x8xf32> to vector<8x8xf32>
    %cst_6 = arith.constant 6.250000e-02 : f32
    %10 = vector.broadcast %cst_6 : f32 to vector<8x8xf32>
    %11 = arith.mulf %9, %10 : vector<8x8xf32>
    %12 = vector.extract_strided_slice %8 {offsets = [8, 0], sizes = [8, 8], strides = [1, 1]} : vector<16x8xf32> to vector<8x8xf32>
    %cst_7 = arith.constant 6.250000e-02 : f32
    %13 = vector.broadcast %cst_7 : f32 to vector<8x8xf32>
    %14 = arith.mulf %12, %13 : vector<8x8xf32>
    %15 = arith.mulf %11, %11 : vector<8x8xf32>
    %16 = arith.subf %14, %15 : vector<8x8xf32>
    %cst_8 = arith.constant 0.000000e+00 : f32
    %17 = vector.broadcast %cst_8 : f32 to vector<8x8xf32>
    %18 = arith.maximumf %16, %17 : vector<8x8xf32>
    %cst_9 = arith.constant 9.99999974E-6 : f32
    %19 = vector.broadcast %cst_9 : f32 to vector<8x8xf32>
    %20 = arith.addf %18, %19 : vector<8x8xf32>
    %21 = math.rsqrt %20 : vector<8x8xf32>
    %22 = tpu.concatenate %11, %21 in 0 : vector<8x8xf32>, vector<8x8xf32> -> vector<16x8xf32>
    %23 = arith.truncf %22 : vector<16x8xf32> to vector<16x8xbf16>
    %c0_10 = arith.constant 0 : index
    %c0_11 = arith.constant 0 : index
    %24 = vector.load %arg6[%c0_10, %c0_11] : memref<8x128xbf16, #tpu.memory_space<vmem>>, vector<8x128xbf16>
    %cst_12 = arith.constant dense<0.000000e+00> : vector<16x128xf32>
    %25 = tpu.matmul %23, %24, %cst_12 {dimension_numbers = #tpu.dot_dimension_numbers<[1], [0], [0], [1], [0, 0, 1, 1], [], []>} : vector<16x8xbf16>, vector<8x128xbf16>, vector<16x128xf32> -> vector<16x128xf32>
    %26 = vector.extract_strided_slice %25 {offsets = [0, 0], sizes = [8, 128], strides = [1, 1]} : vector<16x128xf32> to vector<8x128xf32>
    %27 = arith.subf %2, %26 : vector<8x128xf32>
    %28 = vector.extract_strided_slice %25 {offsets = [8, 0], sizes = [8, 128], strides = [1, 1]} : vector<16x128xf32> to vector<8x128xf32>
    %29 = arith.mulf %27, %28 : vector<8x128xf32>
    %c0_13 = arith.constant 0 : index
    %c0_14 = arith.constant 0 : index
    %30 = vector.load %arg3[%c0_13, %c0_14] : memref<1x128xf32, #tpu.memory_space<vmem>>, vector<1x128xf32>
    %31 = vector.broadcast %30 : vector<1x128xf32> to vector<8x128xf32>
    %32 = arith.mulf %29, %31 : vector<8x128xf32>
    %c0_15 = arith.constant 0 : index
    %c0_16 = arith.constant 0 : index
    %33 = vector.load %arg4[%c0_15, %c0_16] : memref<1x128xf32, #tpu.memory_space<vmem>>, vector<1x128xf32>
    %34 = vector.broadcast %33 : vector<1x128xf32> to vector<8x128xf32>
    %35 = arith.addf %32, %34 : vector<8x128xf32>
    %cst_17 = arith.constant 0.000000e+00 : f32
    %36 = vector.broadcast %cst_17 : f32 to vector<8x128xf32>
    %37 = arith.maximumf %35, %36 : vector<8x128xf32>
    %38 = vector.extract_strided_slice %37 {offsets = [0, 1], sizes = [8, 127], strides = [1, 1]} : vector<8x128xf32> to vector<8x127xf32>
    %39 = vector.extract_strided_slice %37 {offsets = [0, 0], sizes = [8, 1], strides = [1, 1]} : vector<8x128xf32> to vector<8x1xf32>
    %40 = tpu.concatenate %38, %39 in 1 : vector<8x127xf32>, vector<8x1xf32> -> vector<8x128xf32>
    %41 = arith.maximumf %37, %40 : vector<8x128xf32>
    %42 = vector.extract_strided_slice %41 {offsets = [1, 0], sizes = [7, 128], strides = [1, 1]} : vector<8x128xf32> to vector<7x128xf32>
    %43 = vector.extract_strided_slice %41 {offsets = [0, 0], sizes = [1, 128], strides = [1, 1]} : vector<8x128xf32> to vector<1x128xf32>
    %44 = tpu.concatenate %42, %43 in 0 : vector<7x128xf32>, vector<1x128xf32> -> vector<8x128xf32>
    %45 = arith.maximumf %41, %44 : vector<8x128xf32>
    %c0_18 = arith.constant 0 : index
    %c0_19 = arith.constant 0 : index
    %46 = vector.load %arg8[%c0_18, %c0_19] : memref<4x8xbf16, #tpu.memory_space<vmem>>, vector<4x8xbf16>
    %47 = arith.truncf %45 : vector<8x128xf32> to vector<8x128xbf16>
    %cst_20 = arith.constant dense<0.000000e+00> : vector<4x128xf32>
    %48 = tpu.matmul %46, %47, %cst_20 {dimension_numbers = #tpu.dot_dimension_numbers<[1], [0], [0], [1], [0, 0, 1, 1], [], []>} : vector<4x8xbf16>, vector<8x128xbf16>, vector<4x128xf32> -> vector<4x128xf32>
    %49 = arith.truncf %48 : vector<4x128xf32> to vector<4x128xbf16>
    %c0_21 = arith.constant 0 : index
    %c0_22 = arith.constant 0 : index
    %50 = vector.load %arg7[%c0_21, %c0_22] : memref<128x64xbf16, #tpu.memory_space<vmem>>, vector<128x64xbf16>
    %cst_23 = arith.constant dense<0.000000e+00> : vector<4x64xf32>
    %51 = tpu.matmul %49, %50, %cst_23 {dimension_numbers = #tpu.dot_dimension_numbers<[1], [0], [0], [1], [0, 0, 1, 1], [], []>} : vector<4x128xbf16>, vector<128x64xbf16>, vector<4x64xf32> -> vector<4x64xf32>
    %c0_24 = arith.constant 0 : index
    %c0_25 = arith.constant 0 : index
    %52 = vector.load %arg9[%c0_24, %c0_25] : memref<4x64xf32, #tpu.memory_space<vmem>>, vector<4x64xf32>
    tpu.vector_store %arg9[%c0_24, %c0_25], %51 {strides = array<i32>} : memref<4x64xf32, #tpu.memory_space<vmem>>, vector<4x64xf32>,
    return
  }
  func.func @transform_0(%arg0: i32) -> (i32, i32) {
    %c0_i32 = arith.constant 0 : i32
    %c0_i32_0 = arith.constant 0 : i32
    return %c0_i32, %arg0 : i32, i32
  }
  func.func @transform_1(%arg0: i32) -> (i32, i32) {
    %c0_i32 = arith.constant 0 : i32
    %c0_i32_0 = arith.constant 0 : i32
    %c0_i32_1 = arith.constant 0 : i32
    return %c0_i32, %c0_i32_0 : i32, i32
  }
  func.func @transform_2(%arg0: i32) -> (i32, i32) {
    %c0_i32 = arith.constant 0 : i32
    %c0_i32_0 = arith.constant 0 : i32
    %c0_i32_1 = arith.constant 0 : i32
    return %c0_i32, %c0_i32_0 : i32, i32
  }
  func.func @transform_3(%arg0: i32) -> (i32, i32) {
    %c0_i32 = arith.constant 0 : i32
    %c0_i32_0 = arith.constant 0 : i32
    %c0_i32_1 = arith.constant 0 : i32
    return %c0_i32, %c0_i32_0 : i32, i32
  }
  func.func @transform_4(%arg0: i32) -> (i32, i32) {
    %c0_i32 = arith.constant 0 : i32
    %c0_i32_0 = arith.constant 0 : i32
    %c0_i32_1 = arith.constant 0 : i32
    return %c0_i32, %c0_i32_0 : i32, i32
  }
  func.func @transform_5(%arg0: i32) -> (i32, i32) {
    %c0_i32 = arith.constant 0 : i32
    %c0_i32_0 = arith.constant 0 : i32
    %c0_i32_1 = arith.constant 0 : i32
    return %c0_i32, %c0_i32_0 : i32, i32
  }
  func.func @transform_6(%arg0: i32) -> (i32, i32) {
    %c0_i32 = arith.constant 0 : i32
    %c0_i32_0 = arith.constant 0 : i32
    %c0_i32_1 = arith.constant 0 : i32
    return %c0_i32, %c0_i32_0 : i32, i32
  }
  func.func @transform_7(%arg0: i32) -> (i32, i32) {
    %c0_i32 = arith.constant 0 : i32
    %c0_i32_0 = arith.constant 0 : i32
    %c0_i32_1 = arith.constant 0 : i32
    return %c0_i32, %c0_i32_0 : i32, i32
  }
  func.func @transform_8(%arg0: i32) -> (i32, i32) {
    %c0_i32 = arith.constant 0 : i32
    %c0_i32_0 = arith.constant 0 : i32
    return %c0_i32, %arg0 : i32, i32
  }
}

</mosaic_0001>

<bundles_post_ra>
// kernel: tpu_custom_call.1
= control target key start
LH: loop header
LB: loop body
LE: loop exit
PB: predicated region body
PF: predicated region fallthrough
CT: control target
= control target key end

     0   :  { %vm43_vm0 = vcmask 1045504   ;;  %vm39_vm1 = vcmask 97280   ;;  %s573_s0 = inlined_call_operand.vmem [shape: bf16[12,128], index: 0, kind: input, shape index: {}]   ;;  %s574_s1 = inlined_call_operand.vmem [shape: bf16[8,12], index: 1, kind: input, shape index: {}]   ;;  %s575_s2 = inlined_call_operand.vmem [shape: f32[1,128], index: 2, kind: input, shape index: {}]   ;;  %s576_s3 = inlined_call_operand.vmem [shape: f32[1,128], index: 3, kind: input, shape index: {}]   ;;  %s577_s4 = inlined_call_operand.vmem [shape: bf16[128,8], index: 4, kind: input, shape index: {}]   ;;  %s578_s5 = inlined_call_operand.vmem [shape: bf16[8,128], index: 5, kind: input, shape index: {}]   ;;  %s579_s6 = inlined_call_operand.vmem [shape: bf16[128,64], index: 6, kind: input, shape index: {}]   ;;  %s580_s7 = inlined_call_operand.vmem [shape: bf16[4,8], index: 7, kind: input, shape index: {}]   ;;  %s581_s8 = inlined_call_operand.hbm [shape: f32[4,64], index: 8, kind: output, shape index: {}]  }
   0x1   :  { %v331_v0 = vld [vmem:[%s573_s0] sm:$0xf]  ;;  %v400_v1 = vld [vmem:[%s573_s0] sm:$0x30]  ;;  %v408_v3 = vld [vmem:[%s577_s4 + $0x38] sm:$0xff] }
   0x2   :  { %v332_v2 = vor.u32 %v400_v1, %v331_v0  ;;  %135 = vmatpush.bf16.msra.mxu1 %v408_v3  ;;  %v407_v5 = vld [vmem:[%s577_s4 + $0x30] sm:$0xff]  ;;  %v31_v6 = vld [vmem:[%s574_s1] sm:$0xf] }
   0x4   :  { %v45_v4 = vsel %vm43_vm0, %v332_v2, 0 }
   0x5   :  { %54 = vmatpush.bf16.msra.mxu2 %v45_v4 }
   0x6   :  { %13 = vsyncpa [#allocation3], 0  ;;  %136 = vmatpush.bf16.msra.mxu1 %v407_v5  ;;  %v406_v7 = vld [vmem:[%s577_s4 + $0x28] sm:$0xff]  ;;  %v405_v8 = vld [vmem:[%s577_s4 + $0x20] sm:$0xff]  ;;  %vm66_vm2 = vcmask 1043456   ;;  %vm167_vm6 = vcmask 64512  }
   0x7   :  { %v404_v9 = vld [vmem:[%s577_s4 + $0x18] sm:$0xff]  ;;  %v403_v10 = vld [vmem:[%s577_s4 + $0x10] sm:$0xff]  ;;  %v402_v11 = vld [vmem:[%s577_s4 + $0x8] sm:$0xff]  ;;  %s449_s29 = smov 127   ;;  %s450_s22 = smov [#allocation2]   ;;  %vm311_vm7 = vcmask 519168  }
   0x8   :  { %333 = vmatmul.msk.bf16.vlgmr.msra.gmra.mxu2 %vm39_vm1, %v31_v6  ;;  %v401_v12 = vld [vmem:[%s577_s4] sm:$0xff]  ;;  %v416_v48 = vld [vmem:[%s579_s6 + $0x38] sm:$0xff]  ;;  %v415_v49 = vld [vmem:[%s579_s6 + $0x30] sm:$0xff]  ;;  %s318_s23 = sshll.u32 %s450_s22, 4  ;;  %s320_s26 = sshll.u32 %s581_s8, 4  ;;  %s319_s23 = int_to_ptr.vmem [resolvable:$true] %s318_s23  ;;  %s321_s26 = int_to_ptr.hbm [resolvable:$true] %s320_s26 }
   0x9   :  { %v166_v22 = vld [vmem:[%s578_s5] sm:$0xf]  ;;  %298 = vmatpush.bf16.msra.mxu0 %v416_v48  ;;  %v414_v50 = vld [vmem:[%s579_s6 + $0x28] sm:$0xff]  ;;  %v412_v52 = vld [vmem:[%s579_s6 + $0x18] sm:$0xff] }
   0xa   :  { %137 = vmatpush.bf16.msra.mxu1 %v406_v7  ;;  %v172_v23 = vsel %vm66_vm2, %v166_v22, 0  ;;  %v419_v41 = vld [vmem:[%s575_s2] ss:$0 sm:$0xff]  ;;  %v411_v53 = vld [vmem:[%s579_s6 + $0x10] sm:$0xff]  ;;  %v410_v57 = vld [vmem:[%s579_s6 + $0x8] sm:$0xff] }
   0xb   :  { %181 = vmatpush.bf16.msrb.mxu2 %v172_v23  ;;  %v420_v44 = vld [vmem:[%s576_s3] ss:$0 sm:$0xff] }
   0xc   :  { %v413_v51 = vld [vmem:[%s579_s6 + $0x20] sm:$0xff] }
   0xd   :  { %299 = vmatpush.bf16.msra.mxu0 %v415_v49  ;;  %v212_v61 = vld [vmem:[%s580_s7] sm:$0x3] }
   0xe   :  { %138 = vmatpush.bf16.msra.mxu1 %v405_v8  ;;  %v409_v62 = vld [vmem:[%s579_s6] sm:$0xff] }
  0x11   :  { %300 = vmatpush.bf16.msra.mxu0 %v414_v50 }
  0x12   :  { %139 = vmatpush.bf16.msra.mxu1 %v404_v9 }
  0x15   :  { %301 = vmatpush.bf16.msra.mxu0 %v413_v51 }
  0x16   :  { %140 = vmatpush.bf16.msra.mxu1 %v403_v10 }
  0x19   :  { %302 = vmatpush.bf16.msra.mxu0 %v412_v52 }
  0x1a   :  { %141 = vmatpush.bf16.msra.mxu1 %v402_v11 }
  0x1d   :  { %303 = vmatpush.bf16.msra.mxu0 %v411_v53 }
  0x1e   :  { %142 = vmatpush.bf16.msra.mxu1 %v401_v12 }
  0x21   :  { %304 = vmatpush.bf16.msra.mxu0 %v410_v57 }
  0x25   :  { %305 = vmatpush.bf16.msra.mxu0 %v409_v62 }
  0x8b   :  { %v56_v13 = vpop.f32.mrf.mxu2 }
  0x8c   :  { %v61_v14 = vmul.f32 %v56_v13, %v56_v13  ;;  %v60_v17 = vpack.c.bf16 %v56_v13, %v56_v13 }
  0x8e   :  { %v62_v15 = vpack.c.bf16 %v61_v14, %v61_v14 }
  0x90   :  { %v64_v16 = vunpack.c.l.b16 %v62_v15 }
  0x92   :  { %v65_v18 = vpack.c.b16 %v64_v16, %v64_v16 }
  0x93   :  { %v58_v19 = vpop.f32.mrf.mxu2 }
  0x94   :  { %v69_v20 = vsel %vm66_vm2, %v60_v17, %v65_v18 }
  0x95   :  { %143 = vmatmul.bf16.vlgmr.msra.gmra.mxu1 %v69_v20 }
 0x112   :  { %v144_v21 = vpop.f32.mrf.mxu1 }
 0x113   :  { %v149_v24 = vmul.f32 0.0625, %v144_v21 }
 0x115   :  { %v151_v26 = vmul.f32 %v149_v24, %v149_v24 }
 0x11a   :  { %v146_v25 = vpop.f32.mrf.mxu1 }
 0x11b   :  { %v150_v27 = vmul.f32 0.0625, %v146_v25 }
 0x11d   :  { %v152_v28 = vsub.f32 %v150_v27, %v151_v26 }
 0x11f   :  { %v153_v29 = vmax.f32 %v152_v28, 0.0 }
 0x121   :  { %v154_v30 = vadd.f32 1e-05, %v153_v29 }
 0x123   :  { %421 = vrsqrt.f32 %v154_v30  ;;  %vm161_vm4 = vweird.f32 %v154_v30 }
 0x129   :  { %v422_v31 = vpop.eup %421 }
 0x12a   :  { %v156_v32 = vmul.f32 %v422_v31, %v154_v30  ;;  %vm162_vm3 = vweird.f32 %v422_v31 }
 0x12b   :  { %vm163_vm5 = vmor %vm161_vm4, %vm162_vm3 }
 0x12c   :  { %v157_v33 = vmul.f32 %v422_v31, %v156_v32 }
 0x12e   :  { %v158_v34 = vmul.f32 0.5, %v157_v33 }
 0x130   :  { %v159_v35 = vsub.f32 1.5, %v158_v34 }
 0x132   :  { %v160_v36 = vmul.f32 %v422_v31, %v159_v35 }
 0x134   :  { %v164_v37 = vsel %vm163_vm5, %v422_v31, %v160_v36 }
 0x135   :  { %v165_v38 = vpack.c.bf16 %v164_v37, %v149_v24 }
 0x137   :  { %366 = vmatmul.msk.bf16.vlgmr.msrb.gmra.mxu2 %vm167_vm6, %v165_v38 }
 0x1ba   :  { %v183_v39 = vpop.f32.mrf.mxu2 }
 0x1bb   :  { %v188_v40 = vsub.f32 %v56_v13, %v183_v39 }
 0x1c2   :  { %v185_v42 = vpop.f32.mrf.mxu2 }
 0x1c3   :  { %v189_v43 = vmul.f32 %v188_v40, %v185_v42 }
 0x1c5   :  { %v194_v45 = vmul.f32 %v419_v41, %v189_v43 }
 0x1c7   :  { %v199_v46 = vadd.f32 %v420_v44, %v194_v45 }
 0x1c9   :  { %v200_v47 = vmax.f32 %v199_v46, 0.0 }
 0x1cb   :  { %202 = vrot.lane.b32.xlu0 %v200_v47, %s449_s29 }
 0x23d   :  { %v203_v54 = vpop.permute.xlu0 %202 }
 0x23e   :  { %v205_v55 = vmax.f32 %v200_v47, %v203_v54 }
 0x240   :  { %v207_v56 = vrot.slane %v205_v55, 1 }
 0x242   :  { %v211_v58 = vmax.f32 %v205_v55, %v207_v56 }
 0x244   :  { %v213_v59 = vpack.c.bf16 %v211_v58, %v211_v58 }
 0x246   :  { %v218_v60 = vsel %vm66_vm2, %v213_v59, 0 }
 0x247   :  { %227 = vmatpush.bf16.msra.mxu3 %v218_v60 }
 0x24a   :  { %367 = vmatmul.msk.bf16.vlgmr.msra.gmra.mxu3 %vm167_vm6, %v212_v61 }
 0x2cd   :  { %v229_v63 = vpop.f32.mrf.mxu3 }
 0x2ce   :  { %v233_v0 = vpack.c.bf16 %v229_v63, %v229_v63 }
 0x2d0   :  { %306 = vmatmul.bf16.vlgmr.msra.gmra.mxu0 %v233_v0 }
 0x2d5   :  { %v231_v1 = vpop.f32.mrf.mxu3 }
 0x34d   :  { %v307_v2 = vpop.f32.mrf.mxu0 }
 0x34e   :  { %312 = vst.msk [vmem:[#allocation2] sm:$0xf] %vm311_vm7, %v307_v2 }
 0x34f   :  { %323 = dma.vmem_to_hbm [thread:$0]  %s319_s23, 64, %s321_s26, [#allocation3]  }
 0x355   :  { %v309_v3 = vpop.f32.mrf.mxu0 }
 0x356   :  { %447 = dma.done.wait [#allocation3], 64  }
 0x357   :  { %448 = vsyncadd [#allocation3], 4294967232 }
 0x358   :  { %328 = vsyncpa [#allocation3], 1 }

</bundles_post_ra>
